<compile_context>
chip_gen: v7x
topology: tpu7x:2x2x1
jax: 0.10.0
libtpu: 0.0.40
codegen_flags: <defaults>
</compile_context>

<pallas_src>
import functools
import math

import jax
import jax.numpy as jnp
from jax.experimental import pallas as pl
from jax.experimental.pallas import tpu as pltpu

_TARGET_BLOCK_BYTES = 4 * 1024 * 1024      # per x block; amortizes per-step overhead
_VMEM_LIMIT_BYTES = 48 * 1024 * 1024       # explicit scoped-VMEM cap (< v7x physical)


# ----------------------------------------------------------------------------
# Kernel 1: fused global-avg-pool + fc1 + PReLU + fc2 + sigmoid  ->  gate (B,1,C)
# ----------------------------------------------------------------------------
def _se_gate_kernel(x_ref, w1_ref, b1_ref, a_ref, w2_ref, b2_ref, gate_ref,
                    acc_ref, *, hw_total, thw, last_valid):
    j = pl.program_id(1)                       # spatial (reduction) axis, innermost
    nsteps = pl.num_programs(1)

    @pl.when(j == 0)
    def _init():
        acc_ref[...] = jnp.zeros_like(acc_ref)

    xb = x_ref[...].astype(jnp.float32)        # (1, C, thw); upcast after load

    # Steady state: a single full-tile VALU add per step (no per-step XLU reduce).
    if last_valid == thw:                      # tile divides HW: never mask
        acc_ref[...] += xb
    else:
        @pl.when(j < nsteps - 1)
        def _full_tile():
            acc_ref[...] += xb

        @pl.when(j == nsteps - 1)              # boundary mask only on the last tile
        def _last_tile():
            offs = jax.lax.broadcasted_iota(jnp.int32, xb.shape, 2)
            acc_ref[...] += jnp.where(offs < last_valid, xb, 0.0)

    @pl.when(j == nsteps - 1)
    def _finalize():
        total = jnp.sum(acc_ref[...], axis=2)                  # (1, C): one reduce
        mean = total * (1.0 / float(hw_total))
        z = jnp.dot(mean, w1_ref[...],
                    preferred_element_type=jnp.float32) + b1_ref[...]
        a = a_ref[0]                                           # PReLU weight (SMEM)
        z = jnp.where(z > 0.0, z, a * z)                       # PReLU
        z = jnp.dot(z, w2_ref[...],
                    preferred_element_type=jnp.float32) + b2_ref[...]
        y = 0.5 * (jnp.tanh(0.5 * z) + 1.0)                    # stable sigmoid
        gate_ref[...] = y[:, None, :]                          # (1, 1, C)


# ----------------------------------------------------------------------------
# Kernel 2: out = x * gate   (gate broadcast over the spatial/lane axis)
# ----------------------------------------------------------------------------
def _se_scale_kernel(x_ref, gate_ref, o_ref):
    xb = x_ref[...].astype(jnp.float32)                        # (1, C, t)
    o_ref[...] = (xb * gate_ref[...]).astype(o_ref.dtype)      # * (1, C, 1)


# ----------------------------------------------------------------------------
# Wrapper
# ----------------------------------------------------------------------------
def _round_spatial_tile(t, hw):
    """Full HW, or a multiple of 128 clamped to HW (keeps BlockSpecs legal)."""
    if t >= hw:
        return hw
    t = max(128, (t // 128) * 128)
    return min(t, hw)


def _pick_spatial_tile(C, hw, itemsize, target_bytes=_TARGET_BLOCK_BYTES):
    per_col = max(itemsize * C, 1)             # bytes per spatial column (batch tile=1)
    return _round_spatial_tile(target_bytes // per_col, hw)


@functools.partial(jax.jit, static_argnames=("spatial_tile",))
def se_layer(x, params, *, spatial_tile=None):
    """SELayer forward.  x: (B, C, H, W) NCHW.  Returns (B, C, H, W) in x.dtype."""
    B, C, H, W = x.shape
    HW = H * W
    x3 = x.reshape(B, C, HW)                   # keep input dtype: no extra HBM copy

    # PyTorch nn.Linear stores weight as (out, in); use math layout in-kernel.
    w1 = params["fc1_w"].T.astype(jnp.float32)                # (C, R)
    b1 = params["fc1_b"].reshape(1, -1).astype(jnp.float32)   # (1, R)
    w2 = params["fc2_w"].T.astype(jnp.float32)                # (R, C)
    b2 = params["fc2_b"].reshape(1, -1).astype(jnp.float32)   # (1, C)
    a = params["prelu_a"].reshape(1).astype(jnp.float32)      # (1,) PReLU weight
    R = w1.shape[1]

    if spatial_tile is not None:
        thw = _round_spatial_tile(int(spatial_tile), HW)
    else:
        thw = _pick_spatial_tile(C, HW, x.dtype.itemsize)
    ntiles = pl.cdiv(HW, thw)
    last_valid = HW - (ntiles - 1) * thw       # valid spatial columns in last tile

    # --- Pass 1: fused pooled-gate computation (batch parallel, spatial reduce) ---
    gate = pl.pallas_call(
        functools.partial(_se_gate_kernel, hw_total=HW, thw=thw,
                          last_valid=last_valid),
        out_shape=jax.ShapeDtypeStruct((B, 1, C), jnp.float32),
        grid=(B, ntiles),
        in_specs=[
            pl.BlockSpec((1, C, thw), lambda b, j: (b, 0, j)),     # x spatial tiles
            pl.BlockSpec((C, R), lambda b, j: (0, 0)),             # fc1 weight
            pl.BlockSpec((1, R), lambda b, j: (0, 0)),             # fc1 bias
            pl.BlockSpec(memory_space=pltpu.MemorySpace.SMEM),     # PReLU scalar
            pl.BlockSpec((R, C), lambda b, j: (0, 0)),             # fc2 weight
            pl.BlockSpec((1, C), lambda b, j: (0, 0)),             # fc2 bias
        ],
        out_specs=pl.BlockSpec((1, 1, C), lambda b, j: (b, 0, 0)),
        scratch_shapes=[pltpu.VMEM((1, C, thw), jnp.float32)],     # lane-wide accum
        compiler_params=pltpu.CompilerParams(
            dimension_semantics=("parallel", "arbitrary"),
            vmem_limit_bytes=_VMEM_LIMIT_BYTES),
    )(x3, w1, b1, a, w2, b2)

    gate_bc1 = jnp.transpose(gate, (0, 2, 1))                      # (B, C, 1), tiny

    # --- Pass 2: channel-wise gating of x (fully parallel) ------------------------
    out = pl.pallas_call(
        _se_scale_kernel,
        out_shape=jax.ShapeDtypeStruct((B, C, HW), x.dtype),
        grid=(B, ntiles),
        in_specs=[
            pl.BlockSpec((1, C, thw), lambda b, j: (b, 0, j)),
            pl.BlockSpec((1, C, 1), lambda b, j: (b, 0, 0)),
        ],
        out_specs=pl.BlockSpec((1, C, thw), lambda b, j: (b, 0, j)),
        compiler_params=pltpu.CompilerParams(
            dimension_semantics=("parallel", "parallel"),
            vmem_limit_bytes=_VMEM_LIMIT_BYTES),
    )(x3, gate_bc1)

    return out.reshape(B, C, H, W)


# ----------------------------------------------------------------------------
# Pure-JAX reference and synthetic parameters (PyTorch-equivalent semantics)
# ----------------------------------------------------------------------------
def se_layer_ref(x, params):
    y = jnp.mean(x.astype(jnp.float32), axis=(2, 3))          # AdaptiveAvgPool2d(1)
    y = y @ params["fc1_w"].T + params["fc1_b"]               # Linear(C, R)
    y = jnp.where(y > 0.0, y, params["prelu_a"] * y)          # PReLU (single weight)
    y = y @ params["fc2_w"].T + params["fc2_b"]               # Linear(R, C)
    y = jax.nn.sigmoid(y)
    return x.astype(jnp.float32) * y[:, :, None, None]


def make_params(key, channel, reduction=16):
    # NOTE: the spec uses `reduction` directly as the hidden width (Linear(C, 16)).
    k1, k2, k3, k4 = jax.random.split(key, 4)
    return dict(
        fc1_w=jax.random.normal(k1, (reduction, channel), jnp.float32) / math.sqrt(channel),
        fc1_b=0.1 * jax.random.normal(k2, (reduction,), jnp.float32),
        prelu_a=jnp.full((1,), 0.25, jnp.float32),            # nn.PReLU() default init
        fc2_w=jax.random.normal(k3, (channel, reduction), jnp.float32) / math.sqrt(reduction),
        fc2_b=0.1 * jax.random.normal(k4, (channel,), jnp.float32),
    )


# ----------------------------------------------------------------------------
if __name__ == "__main__":
    key = jax.random.PRNGKey(0)
    kp, kx, kp2, kx2, kp3, kx3 = jax.random.split(key, 6)

    # Primary test: small shapes consistent with the module (B=2, C=4, 16x16, f32).
    B, C, H, W = 2, 4, 16, 16
    params = make_params(kp, channel=C, reduction=16)
    x = jax.random.normal(kx, (B, C, H, W), jnp.float32)
    out = se_layer(x, params)
    jax.block_until_ready(out)
    ref = se_layer_ref(x, params)
    assert out.shape == (B, C, H, W), out.shape
    assert bool(jnp.all(jnp.isfinite(out)))
    assert float(jnp.max(jnp.abs(out - ref))) < 5e-3

    # Secondary test: multi-step spatial grid with a partial (masked) last tile.
    B2, C2, H2, W2 = 1, 8, 24, 24                  # HW = 576 -> 5 tiles of 128
    params2 = make_params(kp2, channel=C2, reduction=16)
    x2 = jax.random.normal(kx2, (B2, C2, H2, W2), jnp.float32)
    out2 = se_layer(x2, params2, spatial_tile=128)
    jax.block_until_ready(out2)
    ref2 = se_layer_ref(x2, params2)
    assert float(jnp.max(jnp.abs(out2 - ref2))) < 5e-3

    # Third test: bf16 input streamed in bf16 (no f32 pre-cast), bf16 output.
    B3, C3, H3, W3 = 2, 8, 12, 12
    params3 = make_params(kp3, channel=C3, reduction=16)
    x3 = jax.random.normal(kx3, (B3, C3, H3, W3), jnp.float32).astype(jnp.bfloat16)
    out3 = se_layer(x3, params3)
    jax.block_until_ready(out3)
    assert out3.dtype == jnp.bfloat16
    ref3 = se_layer_ref(x3, params3)
    assert float(jnp.max(jnp.abs(out3.astype(jnp.float32) - ref3))) < 5e-2

    print("KERNEL_OK")
</pallas_src>

<mosaic_0001>
module attributes {stable_mosaic.version = 11 : i64} {
  func.func @_se_gate_kernel(%arg0: i32, %arg1: i32, %arg2: memref<1x4x256xf32, #tpu.memory_space<vmem>>, %arg3: memref<4x16xf32, #tpu.memory_space<vmem>>, %arg4: memref<1x16xf32, #tpu.memory_space<vmem>>, %arg5: memref<1xf32, #tpu.memory_space<smem>>, %arg6: memref<16x4xf32, #tpu.memory_space<vmem>>, %arg7: memref<1x4xf32, #tpu.memory_space<vmem>>, %arg8: memref<1x1x4xf32, #tpu.memory_space<vmem>>, %arg9: memref<1x4x256xf32, #tpu.memory_space<vmem>>) attributes {dimension_semantics = [#tpu.dimension_semantics<parallel>, #tpu.dimension_semantics<arbitrary>], iteration_bounds = array<i64: 2, 1>, scalar_prefetch = 0 : i64, scratch_operands = 1 : i64, tpu.core_type = #tpu.core_type<tc>, window_params = [{transform_indices = @transform_0, window_bounds = array<i64: 1, 4, 256>}, {pipeline_mode = #tpu.pipeline_mode<synchronous>, transform_indices = @transform_1, window_bounds = array<i64: 4, 16>}, {pipeline_mode = #tpu.pipeline_mode<synchronous>, transform_indices = @transform_2, window_bounds = array<i64: 1, 16>}, {transform_indices = @transform_3, window_bounds = array<i64: 1>}, {pipeline_mode = #tpu.pipeline_mode<synchronous>, transform_indices = @transform_4, window_bounds = array<i64: 16, 4>}, {pipeline_mode = #tpu.pipeline_mode<synchronous>, transform_indices = @transform_5, window_bounds = array<i64: 1, 4>}, {transform_indices = @transform_6, window_bounds = array<i64: 1, 1, 4>}]} {
    %c0_i32 = arith.constant 0 : i32
    %0 = arith.cmpi eq, %arg1, %c0_i32 : i32
    %1 = arith.extui %0 : i1 to i32
    %c0_i32_0 = arith.constant 0 : i32
    %2 = arith.cmpi ne, %1, %c0_i32_0 : i32
    scf.if %2 {
      %cst = arith.constant 0.000000e+00 : f32
      %10 = vector.broadcast %cst : f32 to vector<1x4x256xf32>
      %c0_11 = arith.constant 0 : index
      %c0_12 = arith.constant 0 : index
      %c0_13 = arith.constant 0 : index
      %11 = vector.load %arg9[%c0_11, %c0_12, %c0_13] : memref<1x4x256xf32, #tpu.memory_space<vmem>>, vector<1x4x256xf32>
      tpu.vector_store %arg9[%c0_11, %c0_12, %c0_13], %10 {strides = array<i32>} : memref<1x4x256xf32, #tpu.memory_space<vmem>>, vector<1x4x256xf32>,
    } else {
    }
    %c0 = arith.constant 0 : index
    %c0_1 = arith.constant 0 : index
    %c0_2 = arith.constant 0 : index
    %3 = vector.load %arg2[%c0, %c0_1, %c0_2] : memref<1x4x256xf32, #tpu.memory_space<vmem>>, vector<1x4x256xf32>
    %c0_3 = arith.constant 0 : index
    %c0_4 = arith.constant 0 : index
    %c0_5 = arith.constant 0 : index
    %4 = vector.load %arg9[%c0_3, %c0_4, %c0_5] : memref<1x4x256xf32, #tpu.memory_space<vmem>>, vector<1x4x256xf32>
    %5 = arith.addf %4, %3 : vector<1x4x256xf32>
    %c0_6 = arith.constant 0 : index
    %c0_7 = arith.constant 0 : index
    %c0_8 = arith.constant 0 : index
    %6 = vector.load %arg9[%c0_6, %c0_7, %c0_8] : memref<1x4x256xf32, #tpu.memory_space<vmem>>, vector<1x4x256xf32>
    tpu.vector_store %arg9[%c0_6, %c0_7, %c0_8], %5 {strides = array<i32>} : memref<1x4x256xf32, #tpu.memory_space<vmem>>, vector<1x4x256xf32>,
    %c0_i32_9 = arith.constant 0 : i32
    %7 = arith.cmpi eq, %arg1, %c0_i32_9 : i32
    %8 = arith.extui %7 : i1 to i32
    %c0_i32_10 = arith.constant 0 : i32
    %9 = arith.cmpi ne, %8, %c0_i32_10 : i32
    scf.if %9 {
      %c0_11 = arith.constant 0 : index
      %c0_12 = arith.constant 0 : index
      %c0_13 = arith.constant 0 : index
      %10 = vector.load %arg9[%c0_11, %c0_12, %c0_13] : memref<1x4x256xf32, #tpu.memory_space<vmem>>, vector<1x4x256xf32>
      %cst = arith.constant dense<0.000000e+00> : vector<1x4xf32>
      %11 = vector.multi_reduction <add>, %10, %cst [2] : vector<1x4x256xf32> to vector<1x4xf32>
      %cst_14 = arith.constant 3.906250e-03 : f32
      %12 = vector.broadcast %cst_14 : f32 to vector<1x4xf32>
      %13 = arith.mulf %11, %12 : vector<1x4xf32>
      %c0_15 = arith.constant 0 : index
      %c0_16 = arith.constant 0 : index
      %14 = vector.load %arg3[%c0_15, %c0_16] : memref<4x16xf32, #tpu.memory_space<vmem>>, vector<4x16xf32>
      %cst_17 = arith.constant dense<0.000000e+00> : vector<1x16xf32>
      %15 = tpu.matmul %13, %14, %cst_17 {dimension_numbers = #tpu.dot_dimension_numbers<[1], [0], [0], [1], [0, 0, 1, 1], [], []>} : vector<1x4xf32>, vector<4x16xf32>, vector<1x16xf32> -> vector<1x16xf32>
      %c0_18 = arith.constant 0 : index
      %c0_19 = arith.constant 0 : index
      %16 = vector.load %arg4[%c0_18, %c0_19] : memref<1x16xf32, #tpu.memory_space<vmem>>, vector<1x16xf32>
      %17 = arith.addf %15, %16 : vector<1x16xf32>
      %c0_20 = arith.constant 0 : index
      %18 = memref.load %arg5[%c0_20] : memref<1xf32, #tpu.memory_space<smem>>
      %cst_21 = arith.constant 0.000000e+00 : f32
      %19 = vector.broadcast %cst_21 : f32 to vector<1x16xf32>
      %20 = arith.cmpf ogt, %17, %19 : vector<1x16xf32>
      %21 = vector.broadcast %18 : f32 to vector<1x16xf32>
      %22 = arith.mulf %21, %17 : vector<1x16xf32>
      %23 = arith.select %20, %17, %22 : vector<1x16xi1>, vector<1x16xf32>
      %c0_22 = arith.constant 0 : index
      %c0_23 = arith.constant 0 : index
      %24 = vector.load %arg6[%c0_22, %c0_23] : memref<16x4xf32, #tpu.memory_space<vmem>>, vector<16x4xf32>
      %cst_24 = arith.constant dense<0.000000e+00> : vector<1x4xf32>
      %25 = tpu.matmul %23, %24, %cst_24 {dimension_numbers = #tpu.dot_dimension_numbers<[1], [0], [0], [1], [0, 0, 1, 1], [], []>} : vector<1x16xf32>, vector<16x4xf32>, vector<1x4xf32> -> vector<1x4xf32>
      %c0_25 = arith.constant 0 : index
      %c0_26 = arith.constant 0 : index
      %26 = vector.load %arg7[%c0_25, %c0_26] : memref<1x4xf32, #tpu.memory_space<vmem>>, vector<1x4xf32>
      %27 = arith.addf %25, %26 : vector<1x4xf32>
      %cst_27 = arith.constant 5.000000e-01 : f32
      %28 = vector.broadcast %cst_27 : f32 to vector<1x4xf32>
      %29 = arith.mulf %28, %27 : vector<1x4xf32>
      %30 = math.tanh %29 : vector<1x4xf32>
      %cst_28 = arith.constant 1.000000e+00 : f32
      %31 = vector.broadcast %cst_28 : f32 to vector<1x4xf32>
      %32 = arith.addf %30, %31 : vector<1x4xf32>
      %cst_29 = arith.constant 5.000000e-01 : f32
      %33 = vector.broadcast %cst_29 : f32 to vector<1x4xf32>
      %34 = arith.mulf %33, %32 : vector<1x4xf32>
      %35 = vector.shape_cast %34 : vector<1x4xf32> to vector<1x1x4xf32>
      %c0_30 = arith.constant 0 : index
      %c0_31 = arith.constant 0 : index
      %c0_32 = arith.constant 0 : index
      %36 = vector.load %arg8[%c0_30, %c0_31, %c0_32] : memref<1x1x4xf32, #tpu.memory_space<vmem>>, vector<1x1x4xf32>
      tpu.vector_store %arg8[%c0_30, %c0_31, %c0_32], %35 {strides = array<i32>} : memref<1x1x4xf32, #tpu.memory_space<vmem>>, vector<1x1x4xf32>,
    } else {
    }
    return
  }
  func.func @transform_0(%arg0: i32, %arg1: i32) -> (i32, i32, i32) {
    %c0_i32 = arith.constant 0 : i32
    %c0_i32_0 = arith.constant 0 : i32
    return %arg0, %c0_i32, %arg1 : i32, i32, i32
  }
  func.func @transform_1(%arg0: i32, %arg1: i32) -> (i32, i32) {
    %c0_i32 = arith.constant 0 : i32
    %c0_i32_0 = arith.constant 0 : i32
    %c0_i32_1 = arith.constant 0 : i32
    return %c0_i32, %c0_i32_0 : i32, i32
  }
  func.func @transform_2(%arg0: i32, %arg1: i32) -> (i32, i32) {
    %c0_i32 = arith.constant 0 : i32
    %c0_i32_0 = arith.constant 0 : i32
    %c0_i32_1 = arith.constant 0 : i32
    return %c0_i32, %c0_i32_0 : i32, i32
  }
  func.func @transform_3(%arg0: i32, %arg1: i32) -> i32 {
    %c0_i32 = arith.constant 0 : i32
    %c0_i32_0 = arith.constant 0 : i32
    return %c0_i32 : i32
  }
  func.func @transform_4(%arg0: i32, %arg1: i32) -> (i32, i32) {
    %c0_i32 = arith.constant 0 : i32
    %c0_i32_0 = arith.constant 0 : i32
    %c0_i32_1 = arith.constant 0 : i32
    return %c0_i32, %c0_i32_0 : i32, i32
  }
  func.func @transform_5(%arg0: i32, %arg1: i32) -> (i32, i32) {
    %c0_i32 = arith.constant 0 : i32
    %c0_i32_0 = arith.constant 0 : i32
    %c0_i32_1 = arith.constant 0 : i32
    return %c0_i32, %c0_i32_0 : i32, i32
  }
  func.func @transform_6(%arg0: i32, %arg1: i32) -> (i32, i32, i32) {
    %c0_i32 = arith.constant 0 : i32
    %c0_i32_0 = arith.constant 0 : i32
    %c0_i32_1 = arith.constant 0 : i32
    return %arg0, %c0_i32, %c0_i32_0 : i32, i32, i32
  }
}

module attributes {stable_mosaic.version = 11 : i64} {
  func.func @_se_scale_kernel(%arg0: i32, %arg1: i32, %arg2: memref<1x4x256xf32, #tpu.memory_space<vmem>>, %arg3: memref<1x4x1xf32, #tpu.memory_space<vmem>>, %arg4: memref<1x4x256xf32, #tpu.memory_space<vmem>>) attributes {dimension_semantics = [#tpu.dimension_semantics<parallel>, #tpu.dimension_semantics<parallel>], iteration_bounds = array<i64: 2, 1>, scalar_prefetch = 0 : i64, scratch_operands = 0 : i64, tpu.core_type = #tpu.core_type<tc>, window_params = [{transform_indices = @transform_0, window_bounds = array<i64: 1, 4, 256>}, {transform_indices = @transform_1, window_bounds = array<i64: 1, 4, 1>}, {transform_indices = @transform_2, window_bounds = array<i64: 1, 4, 256>}]} {
    %c0 = arith.constant 0 : index
    %c0_0 = arith.constant 0 : index
    %c0_1 = arith.constant 0 : index
    %0 = vector.load %arg2[%c0, %c0_0, %c0_1] : memref<1x4x256xf32, #tpu.memory_space<vmem>>, vector<1x4x256xf32>
    %c0_2 = arith.constant 0 : index
    %c0_3 = arith.constant 0 : index
    %c0_4 = arith.constant 0 : index
    %1 = vector.load %arg3[%c0_2, %c0_3, %c0_4] : memref<1x4x1xf32, #tpu.memory_space<vmem>>, vector<1x4x1xf32>
    %2 = vector.broadcast %1 : vector<1x4x1xf32> to vector<1x4x256xf32>
    %3 = arith.mulf %0, %2 : vector<1x4x256xf32>
    %c0_5 = arith.constant 0 : index
    %c0_6 = arith.constant 0 : index
    %c0_7 = arith.constant 0 : index
    %4 = vector.load %arg4[%c0_5, %c0_6, %c0_7] : memref<1x4x256xf32, #tpu.memory_space<vmem>>, vector<1x4x256xf32>
    tpu.vector_store %arg4[%c0_5, %c0_6, %c0_7], %3 {strides = array<i32>} : memref<1x4x256xf32, #tpu.memory_space<vmem>>, vector<1x4x256xf32>,
    return
  }
  func.func @transform_0(%arg0: i32, %arg1: i32) -> (i32, i32, i32) {
    %c0_i32 = arith.constant 0 : i32
    %c0_i32_0 = arith.constant 0 : i32
    return %arg0, %c0_i32, %arg1 : i32, i32, i32
  }
  func.func @transform_1(%arg0: i32, %arg1: i32) -> (i32, i32, i32) {
    %c0_i32 = arith.constant 0 : i32
    %c0_i32_0 = arith.constant 0 : i32
    %c0_i32_1 = arith.constant 0 : i32
    return %arg0, %c0_i32, %c0_i32_0 : i32, i32, i32
  }
  func.func @transform_2(%arg0: i32, %arg1: i32) -> (i32, i32, i32) {
    %c0_i32 = arith.constant 0 : i32
    %c0_i32_0 = arith.constant 0 : i32
    return %arg0, %c0_i32, %arg1 : i32, i32, i32
  }
}

</mosaic_0001>

<bundles_post_ra>
// kernel: se_layer.3
= control target key start
LH: loop header
LB: loop body
LE: loop exit
PB: predicated region body
PF: predicated region fallthrough
CT: control target
= control target key end

     0   :  { %s397_s9 = smov 0   ;;  %s399_s10 = smov 0   ;;  %s430_s0 = inlined_call_operand.vmem [shape: f32[2,4,256], index: 0, kind: input, shape index: {}]   ;;  %s431_s1 = inlined_call_operand.vmem [shape: f32[2,4,1], index: 1, kind: input, shape index: {}]   ;;  %s432_s2 = inlined_call_operand.vmem [shape: f32[2,4,256], index: 2, kind: output, shape index: {}]  }
   0x1   :  { %s401_s11 = smov 0  }
   0x2 LB: > { %s24_s12 = sadd.s32 1, %s374_s10  ;;  %p319_p0 = scmp.ge.s32.totalorder %s378_s11, 1  ;;  %s378_s11 = sphi %s401_s11, %s12_s11   ;;  %s374_s10 = sphi %s399_s10, %s434_s10   ;;  %s370_s9 = sphi %s397_s9, %s433_s9  }
   0x3   : > { %p26_p1 = scmp.ge.s32.totalorder %s24_s12, 2  ;;  %p142_p2 = scmp.lt.s32.totalorder %s378_s11, 3 }
   0x5   : > { %s436_s12 = smov (%p26_p1, %s24_s12), 0  ;;  %p143_p3 = pnand %p319_p0, %p142_p2 }
   0x6   : > { %p177_p4 = scmp.lt.s32.totalorder (!%p143_p3), %s370_s9, 1  ;;  %v380_v0 = vmov (!%p143_p3), 0   ;;  %v381_v2 = vmov (!%p143_p3), 839922192   ;;  %v209_v4 = vlaneseq (!%p143_p3) }
   0x7   : > { %146 = sbr.rel (%p143_p3) target bundleno = 151 (0x97), region = 28  ;;  %355 = vset.pattern.permute.xlu0 (!%p143_p3), %v380_v0  ;;  %v207_v3 = vunpack.c.l.s4 (!%p143_p3), %v381_v2 }
   0x8   : > { %v210_v6 = vshrl.u32 (!%p143_p3), %v209_v4, 7 }
   0x9   : > { %v208_v5 = vunpack.c.0.s8 (!%p143_p3), %v207_v3 }
   0xb   : > { %v211_v7 = vsub.s32 (!%p143_p3), %v208_v5, %v210_v6 }
   0xe   : > { %s438_s9 = smov (!%p177_p4, %s370_s9), 1 }
   0xf   : > { %s322_s13 = sshll.u32 %s438_s9, 2  ;;  %s327_s17 = sshll.u32 %s438_s9, 3 }
  0x10   : > { %s189_s16 = scalar_lea.vmem %s431_s1, %s322_s13  ;;  %s184_s20 = scalar_lea.vmem %s430_s0, %s327_s17 }
  0x11   : > { %v201_v1 = vld [vmem:[%s189_s16] sm:$0xf]  ;;  %s198_s23 = scalar_lea.vmem %s432_s2, %s327_s17 }
  0x12   : > { %204 = vperm.xlu0 %355, %v201_v1   ;;  %v200_v9 = vld [vmem:[%s184_s20] sm:$0xff] }
  0x91   : > { %v205_v8 = vpop.permute.xlu0 %204 }
  0x92   : > { %v212_v10 = vrot.slane %v205_v8, %v211_v7 }
  0x94   : > { %v214_v11 = vmul.f32 %v212_v10, %v200_v9 }
  0x96   : > { %215 = vst [vmem:[%s198_s23] sm:$0xff] %v214_v11 }
  0x97 PF: > { %s12_s11 = sadd.s32 1, %s378_s11   ;;  %s433_s9 = smov %s374_s10 }
  0x98   : > { %p9_p5 = scmp.ge.s32.totalorder %s12_s11, 4   ;;  %s434_s10 = smov %s436_s12 }
  0x9a   :  { %11 = sbr.rel (!%p9_p5) target bundleno = 2 (0x2), region = 61 }

// kernel: se_layer.2
= control target key start
LH: loop header
LB: loop body
LE: loop exit
PB: predicated region body
PF: predicated region fallthrough
CT: control target
= control target key end

     0   :  { %s662_s23 = smov 0   ;;  %s664_s24 = smov 0   ;;  %s714_s0 = inlined_call_operand.vmem [shape: f32[2,4,256], index: 0, kind: input, shape index: {}]   ;;  %s715_s1 = inlined_call_operand.vmem [shape: f32[4,16], index: 1, kind: input, shape index: {}]   ;;  %s716_s2 = inlined_call_operand.vmem [shape: f32[1,16], index: 2, kind: input, shape index: {}]   ;;  %s717_s3 = inlined_call_operand.<no memory space> [shape: f32[1], index: 3, kind: input, shape index: {}]   ;;  %s718_s4 = inlined_call_operand.vmem [shape: f32[16,4], index: 4, kind: input, shape index: {}]   ;;  %s719_s5 = inlined_call_operand.vmem [shape: f32[1,4], index: 5, kind: input, shape index: {}]   ;;  %s720_s6 = inlined_call_operand.vmem [shape: f32[2,1,4], index: 6, kind: output, shape index: {}]  }
   0x1   :  { %11 = sst [smem:[#allocation3]] %s717_s3  ;;  %s666_s25 = smov 0  }
   0x2 LB: > { %s29_s3 = sadd.s32 1, %s615_s24  ;;  %p538_p0 = scmp.ge.s32.totalorder %s619_s25, 1  ;;  %s619_s25 = sphi %s666_s25, %s17_s25   ;;  %s615_s24 = sphi %s664_s24, %s722_s24   ;;  %s611_s23 = sphi %s662_s23, %s721_s23  }
   0x3   : > { %p31_p1 = scmp.ge.s32.totalorder %s29_s3, 2  ;;  %p232_p2 = scmp.lt.s32.totalorder %s619_s25, 3 }
   0x5   : > { %s724_s3 = smov (%p31_p1, %s29_s3), 0  ;;  %p233_p3 = pnand %p538_p0, %p232_p2 }
   0x6   : > { %p265_p4 = scmp.lt.s32.totalorder (!%p233_p3), %s611_s23, 1  ;;  %vm293_vm0 = vcmask (!%p233_p3), 1043456   ;;  %v621_v5 = vmov (!%p233_p3), 0.0   ;;  %v300_v6 = vld [vmem:[%s715_s1] sm:$0xf] (!%p233_p3)  ;;  %vm622_vm1 = vmmov (!%p233_p3), 0   ;;  %v303_v7 = vlaneseq (!%p233_p3) }
   0x7   : > { %236 = sbr.rel (%p233_p3) target bundleno = 618 (0x26a), region = 44  ;;  %552 = vmatprep.subr.mxu0 (!%p233_p3), %v621_v5  ;;  %554 = vmatprep.mubr.msk.f32.mxu0 (!%p233_p3), %vm622_vm1, %v621_v5  ;;  %vm309_vm2 = vcmask (!%p233_p3), 31744   ;;  %v390_v14 = vld [vmem:[%s718_s4] sm:$0xff] (!%p233_p3)  ;;  %v391_v15 = vld [vmem:[%s718_s4 + $0x8] sm:$0xff] (!%p233_p3)  ;;  %v623_v17 = vmov (!%p233_p3), 0.0|0.0   ;;  %s385_s12 = sld [smem:[#allocation3]] (!%p233_p3) }
   0x8   : > { %553 = vmatpush3.msk.msra.mxu0 (!%p233_p3), %vm293_vm0, %v300_v6  ;;  %561 = vmatprep.mubr.msk.f32.mxu1 (!%p233_p3), %vm622_vm1, %v621_v5  ;;  %v304_v8 = vand.u32 (!%p233_p3), 127, %v303_v7  ;;  %v306_v9 = vshrl.u32 (!%p233_p3), %v303_v7, 7  ;;  %v565_v16 = vpack.c.bf16 (!%p233_p3), %v391_v15, %v390_v14  ;;  %v301_v18 = vld [vmem:[%s716_s2] sm:$0x1] (!%p233_p3)  ;;  %vm393_vm4 = vcmask (!%p233_p3), 130048  }
   0x9   : > { %564 = vmatprep.subr.bf16.mxu1 (!%p233_p3), %v623_v17  ;;  %v392_v25 = vld [vmem:[%s719_s5] sm:$0x1] (!%p233_p3)  ;;  %vm471_vm5 = vcmask (!%p233_p3), 24576  }
   0xa   : > { %v307_v10 = vsub.s32 (!%p233_p3), %v304_v8, %v306_v9  ;;  %566 = vmatpush3.bf16.msra.mxu1 (!%p233_p3), %v565_v16 }
   0xd   : > { %v387_v20 = vstv (!%p233_p3), %s385_s12 }
   0xe   : > { %s726_s23 = smov (!%p265_p4, %s611_s23), 1 }
   0xf   : > { %s546_s26 = sshll.u32 %s726_s23, 3  ;;  %s276_s19 = scalar_lea.vmem %s720_s6, %s726_s23 }
  0x10   : > { %s272_s29 = scalar_lea.vmem %s714_s0, %s546_s26 }
  0x11   : > { %v282_v0 = vld [vmem:[%s272_s29] sm:$0xff] }
  0x12   : > { %v291_v1 = vcombine.high %v282_v0, %v282_v0  ;;  %v294_v2 = vsel %vm293_vm0, %v282_v0, 0.0 }
  0x14   : > { %v295_v3 = vsel %vm293_vm0, %v291_v1, 0.0 }
  0x15   : > { %v296_v4 = vadd.f32 %v295_v3, %v294_v2 }
  0x17   : > { %297 = vadd.xlane.f32.xlu0 %v296_v4 }
  0xa4   : > { %v298_v11 = vpop.xlane.xlu0 %297 }
  0xa5   : > { %v299_v12 = vmul.f32 0.00390625, %v298_v11 }
  0xa7   : > { %v308_v13 = vrot.slane %v299_v12, %v307_v10 }
  0xa9   : > { %555 = vmatmul.mubr.msk.f32.vlgmr.msra.gmra.mrb[0].mxu0 %vm309_vm2, %v308_v13 }
 0x17c   : > { %v381_v19 = vpop.f32.mrb[0].mxu0 }
 0x17d   : > { %v382_v21 = vadd.f32 %v381_v19, %v301_v18  ;;  %v556_v22 = vpop.f32.mrb[1].mxu0 }
 0x17f   : > { %vm386_vm3 = vcmp.gt.f32.partialorder %v382_v21, 0.0  ;;  %v388_v23 = vmul.f32 %v387_v20, %v382_v21 }
 0x181   : > { %v389_v24 = vsel %vm386_vm3, %v382_v21, %v388_v23 }
 0x182   : > { %562 = vmatmul.mubr.msk.f32.vlgmr.msra.gmra.mrb[0].mxu1 %vm393_vm4, %v389_v24 }
 0x255   : > { %v463_v26 = vpop.f32.mrb[0].mxu1 }
 0x256   : > { %v464_v27 = vadd.f32 %v463_v26, %v392_v25  ;;  %v563_v28 = vpop.f32.mrb[1].mxu1 }
 0x258   : > { %v467_v29 = vmul.f32 0.5, %v464_v27 }
 0x25a   : > { %595 = vtanh.f32 %v467_v29 }
 0x264   : > { %v596_v30 = vpop.eup %595 }
 0x265   : > { %v469_v31 = vadd.f32 1.0, %v596_v30 }
 0x267   : > { %v470_v32 = vmul.f32 0.5, %v469_v31 }
 0x269   : > { %472 = vst.msk [vmem:[%s276_s19] sm:$0x1] %vm471_vm5, %v470_v32 }
 0x26a PF: > { %s17_s25 = sadd.s32 1, %s619_s25   ;;  %s721_s23 = smov %s615_s24 }
 0x26b   : > { %p14_p5 = scmp.ge.s32.totalorder %s17_s25, 4   ;;  %s722_s24 = smov %s724_s3 }
 0x26d   :  { %16 = sbr.rel (!%p14_p5) target bundleno = 2 (0x2), region = 82 }

</bundles_post_ra>
